<compile_context>
chip_gen: v6e
topology: v6e:2x2x1
jax: 0.10.0
libtpu: 0.0.40
codegen_flags: <defaults>
</compile_context>

<pallas_src>
import functools

import jax
import jax.numpy as jnp
from jax.experimental import pallas as pl
from jax.experimental.pallas import tpu as pltpu

EPS = 1e-5  # torch.nn.InstanceNorm2d default


def _cond_in_kernel(x_ref, g_ref, b_ref, o_ref, *, inv_hw):
    # x_ref/o_ref: (R, HW)   g_ref/b_ref: (R, 1)
    # Pass 1: per-row mean (single fused read->reduce, nothing kept live).
    mean = jnp.sum(x_ref[...].astype(jnp.float32), axis=-1, keepdims=True) * inv_hw

    # Pass 2: centered (numerically stable) biased variance; re-read x_ref so
    # the elementwise producers fuse into the lane reduction per vreg strip.
    var = jnp.sum(
        jnp.square(x_ref[...].astype(jnp.float32) - mean),
        axis=-1, keepdims=True) * inv_hw

    gamma = g_ref[...].astype(jnp.float32)                       # (R, 1)
    beta = b_ref[...].astype(jnp.float32)                        # (R, 1)

    # Fold normalize + affine into a single scale/shift per element.
    scale = gamma * jax.lax.rsqrt(var + EPS)                     # (R, 1)
    shift = beta - mean * scale                                  # (R, 1)

    # Pass 3: re-read x_ref, 2 VALU ops / element, store.
    o_ref[...] = (x_ref[...].astype(jnp.float32) * scale + shift).astype(o_ref.dtype)


def _pick_row_block(rows, bytes_per_row, sublane):
    """Row-block size: ~4 MiB per-buffer tile, multiple of `sublane`,
    prefer a divisor of `rows`, keep >= 4 grid steps when rows allow."""
    target = 4 * 1024 * 1024
    r = (target // max(bytes_per_row, 1)) // sublane * sublane
    r = max(sublane, r)
    # Keep at least ~4 grid steps so v7x's 2 TensorCores both get work.
    if rows >= 4 * sublane:
        r = max(sublane, min(r, (rows // 4) // sublane * sublane))
    if r >= rows:
        return rows  # single full-extent row block (bypasses the sublane rule)
    # Prefer a nearby divisor of rows to avoid a ragged final block.
    d = r
    while d >= max(sublane, r // 2):
        if rows % d == 0:
            return d
        d -= sublane
    return r  # ragged final block; Pallas masks the out-of-bounds stores.


def conditional_instance_norm_2d(x, style_index, embed_weight, num_features):
    """x: (N, C, H, W); style_index: (N,) int32;
    embed_weight: (num_classes, 2*num_features)."""
    N, C, H, W = x.shape
    assert C == num_features
    HW = H * W
    rows = N * C

    # --- Glue: tiny embedding gather, reshaped to per-row gamma/beta --------
    emb = embed_weight[style_index]                    # (N, 2C)
    gamma = emb[:, :C].reshape(rows, 1).astype(jnp.float32)
    beta = emb[:, C:].reshape(rows, 1).astype(jnp.float32)

    # Free (metadata-only) reshape; no HBM copy, no padding, no slicing.
    x2 = x.reshape(rows, HW)

    itemsize = jnp.dtype(x.dtype).itemsize
    sublane = {4: 8, 2: 16, 1: 32}.get(itemsize, 8)
    R = _pick_row_block(rows, HW * itemsize, sublane)
    n_blocks = pl.cdiv(rows, R)

    # VMEM footprint ~= 2 buffers (in+out) x double-buffering x tile bytes.
    tile_bytes = R * HW * itemsize
    vmem_limit = int(min(100 * 1024 * 1024,
                         max(32 * 1024 * 1024, 4 * tile_bytes + 8 * 1024 * 1024)))

    kernel = functools.partial(_cond_in_kernel, inv_hw=float(1.0 / HW))

    cost = pl.CostEstimate(
        flops=7 * rows * HW,
        transcendentals=rows,
        bytes_accessed=2 * rows * HW * itemsize + 2 * rows * 4,
    )

    out = pl.pallas_call(
        kernel,
        out_shape=jax.ShapeDtypeStruct((rows, HW), x.dtype),
        grid_spec=pltpu.PrefetchScalarGridSpec(
            num_scalar_prefetch=0,
            grid=(n_blocks,),
            in_specs=[
                pl.BlockSpec((R, HW), lambda i: (i, 0)),
                pl.BlockSpec((R, 1), lambda i: (i, 0)),
                pl.BlockSpec((R, 1), lambda i: (i, 0)),
            ],
            out_specs=pl.BlockSpec((R, HW), lambda i: (i, 0)),
        ),
        compiler_params=pltpu.CompilerParams(
            dimension_semantics=("parallel",),
            vmem_limit_bytes=vmem_limit,
        ),
        cost_estimate=cost,
    )(x2, gamma, beta)

    return out.reshape(N, C, H, W)


def _reference(x, style_index, embed_weight, num_features):
    # Pure-JAX reference mirroring the PyTorch forward.
    xf = x.astype(jnp.float32)
    mean = jnp.mean(xf, axis=(2, 3), keepdims=True)
    var = jnp.var(xf, axis=(2, 3), keepdims=True)  # biased, like InstanceNorm2d
    out = (xf - mean) / jnp.sqrt(var + EPS)
    emb = embed_weight[style_index]
    gamma = emb[:, :num_features].reshape(-1, num_features, 1, 1)
    beta = emb[:, num_features:].reshape(-1, num_features, 1, 1)
    return (gamma * out + beta).astype(x.dtype)


if __name__ == "__main__":
    num_features = 4
    num_classes = 3
    N, C, H, W = 2, num_features, 16, 16

    key = jax.random.PRNGKey(0)
    kx, kw = jax.random.split(key)

    x = jax.random.normal(kx, (N, C, H, W), dtype=jnp.float32)
    style_index = jnp.array([1, 2], dtype=jnp.int32)

    # Embedding weight init per the module's __init__:
    # first num_features cols ~ Normal(mean=1, std=0.02), rest zeros.
    gamma_part = 1.0 + 0.02 * jax.random.normal(
        kw, (num_classes, num_features), dtype=jnp.float32)
    beta_part = jnp.zeros((num_classes, num_features), dtype=jnp.float32)
    embed_weight = jnp.concatenate([gamma_part, beta_part], axis=1)

    out = conditional_instance_norm_2d(x, style_index, embed_weight, num_features)
    out = jax.block_until_ready(out)

    ref = _reference(x, style_index, embed_weight, num_features)
    assert out.shape == (N, C, H, W)
    assert jnp.allclose(out, ref, atol=1e-4, rtol=1e-4)

    print("KERNEL_OK")
</pallas_src>

<mosaic_0001>
module attributes {stable_mosaic.version = 11 : i64} {
  func.func @_cond_in_kernel(%arg0: i32, %arg1: memref<8x256xf32, #tpu.memory_space<vmem>>, %arg2: memref<8x1xf32, #tpu.memory_space<vmem>>, %arg3: memref<8x1xf32, #tpu.memory_space<vmem>>, %arg4: memref<8x256xf32, #tpu.memory_space<vmem>>) attributes {dimension_semantics = [#tpu.dimension_semantics<parallel>], iteration_bounds = array<i64: 1>, scalar_prefetch = 0 : i64, scratch_operands = 0 : i64, tpu.core_type = #tpu.core_type<tc>, window_params = [{transform_indices = @transform_0, window_bounds = array<i64: 8, 256>}, {transform_indices = @transform_1, window_bounds = array<i64: 8, 1>}, {transform_indices = @transform_2, window_bounds = array<i64: 8, 1>}, {transform_indices = @transform_3, window_bounds = array<i64: 8, 256>}]} {
    %c0 = arith.constant 0 : index
    %c0_0 = arith.constant 0 : index
    %0 = vector.load %arg1[%c0, %c0_0] : memref<8x256xf32, #tpu.memory_space<vmem>>, vector<8x256xf32>
    %cst = arith.constant dense<0.000000e+00> : vector<8xf32>
    %1 = vector.multi_reduction <add>, %0, %cst [1] : vector<8x256xf32> to vector<8xf32>
    %2 = vector.shape_cast %1 : vector<8xf32> to vector<8x1xf32>
    %cst_1 = arith.constant 3.906250e-03 : f32
    %3 = vector.broadcast %cst_1 : f32 to vector<8x1xf32>
    %4 = arith.mulf %2, %3 : vector<8x1xf32>
    %c0_2 = arith.constant 0 : index
    %c0_3 = arith.constant 0 : index
    %5 = vector.load %arg1[%c0_2, %c0_3] : memref<8x256xf32, #tpu.memory_space<vmem>>, vector<8x256xf32>
    %6 = vector.broadcast %4 : vector<8x1xf32> to vector<8x256xf32>
    %7 = arith.subf %5, %6 : vector<8x256xf32>
    %8 = arith.mulf %7, %7 : vector<8x256xf32>
    %cst_4 = arith.constant dense<0.000000e+00> : vector<8xf32>
    %9 = vector.multi_reduction <add>, %8, %cst_4 [1] : vector<8x256xf32> to vector<8xf32>
    %10 = vector.shape_cast %9 : vector<8xf32> to vector<8x1xf32>
    %cst_5 = arith.constant 3.906250e-03 : f32
    %11 = vector.broadcast %cst_5 : f32 to vector<8x1xf32>
    %12 = arith.mulf %10, %11 : vector<8x1xf32>
    %c0_6 = arith.constant 0 : index
    %c0_7 = arith.constant 0 : index
    %13 = vector.load %arg2[%c0_6, %c0_7] : memref<8x1xf32, #tpu.memory_space<vmem>>, vector<8x1xf32>
    %c0_8 = arith.constant 0 : index
    %c0_9 = arith.constant 0 : index
    %14 = vector.load %arg3[%c0_8, %c0_9] : memref<8x1xf32, #tpu.memory_space<vmem>>, vector<8x1xf32>
    %cst_10 = arith.constant 9.99999974E-6 : f32
    %15 = vector.broadcast %cst_10 : f32 to vector<8x1xf32>
    %16 = arith.addf %12, %15 : vector<8x1xf32>
    %17 = math.rsqrt %16 : vector<8x1xf32>
    %18 = arith.mulf %13, %17 : vector<8x1xf32>
    %19 = arith.mulf %4, %18 : vector<8x1xf32>
    %20 = arith.subf %14, %19 : vector<8x1xf32>
    %c0_11 = arith.constant 0 : index
    %c0_12 = arith.constant 0 : index
    %21 = vector.load %arg1[%c0_11, %c0_12] : memref<8x256xf32, #tpu.memory_space<vmem>>, vector<8x256xf32>
    %22 = vector.broadcast %18 : vector<8x1xf32> to vector<8x256xf32>
    %23 = arith.mulf %21, %22 : vector<8x256xf32>
    %24 = vector.broadcast %20 : vector<8x1xf32> to vector<8x256xf32>
    %25 = arith.addf %23, %24 : vector<8x256xf32>
    %c0_13 = arith.constant 0 : index
    %c0_14 = arith.constant 0 : index
    %26 = vector.load %arg4[%c0_13, %c0_14] : memref<8x256xf32, #tpu.memory_space<vmem>>, vector<8x256xf32>
    tpu.vector_store %arg4[%c0_13, %c0_14], %25 {strides = array<i32>} : memref<8x256xf32, #tpu.memory_space<vmem>>, vector<8x256xf32>,
    return
  }
  func.func @transform_0(%arg0: i32) -> (i32, i32) {
    %c0_i32 = arith.constant 0 : i32
    %c0_i32_0 = arith.constant 0 : i32
    return %arg0, %c0_i32 : i32, i32
  }
  func.func @transform_1(%arg0: i32) -> (i32, i32) {
    %c0_i32 = arith.constant 0 : i32
    %c0_i32_0 = arith.constant 0 : i32
    return %arg0, %c0_i32 : i32, i32
  }
  func.func @transform_2(%arg0: i32) -> (i32, i32) {
    %c0_i32 = arith.constant 0 : i32
    %c0_i32_0 = arith.constant 0 : i32
    return %arg0, %c0_i32 : i32, i32
  }
  func.func @transform_3(%arg0: i32) -> (i32, i32) {
    %c0_i32 = arith.constant 0 : i32
    %c0_i32_0 = arith.constant 0 : i32
    return %arg0, %c0_i32 : i32, i32
  }
}

</mosaic_0001>

<bundles_post_ra>
// kernel: tpu_custom_call.1
= control target key start
LH: loop header
LB: loop body
LE: loop exit
PB: predicated region body
PF: predicated region fallthrough
CT: control target
= control target key end

     0   :  { %s131_s0 = inlined_call_operand.vmem [shape: f32[8,256], index: 0, kind: input, shape index: {}]   ;;  %s132_s1 = inlined_call_operand.vmem [shape: f32[8,1], index: 1, kind: input, shape index: {}]   ;;  %s133_s2 = inlined_call_operand.vmem [shape: f32[8,1], index: 2, kind: input, shape index: {}]   ;;  %s134_s3 = inlined_call_operand.hbm [shape: f32[8,256], index: 3, kind: output, shape index: {}]  }
   0x1   :  { %v15_v0 = vld [vmem:[%s131_s0] sm:$0xff]  ;;  %v16_v1 = vld [vmem:[%s131_s0 + $0x8] sm:$0xff] }
   0x2   :  { %8 = vsyncpa [#allocation3], 0  ;;  %v17_v2 = vadd.f32 %v16_v1, %v15_v0  ;;  %v94_v10 = vmov 0   ;;  %v29_v14 = vld [vmem:[%s132_s1] sm:$0xff]  ;;  %s95_s19 = smov [#allocation2]  }
   0x3   :  { %68 = vset.pattern.permute.xlu1 %v94_v10  ;;  %69 = vset.pattern.permute.xlu0 %v94_v10  ;;  %v30_v17 = vld [vmem:[%s133_s2] sm:$0xff]  ;;  %s58_s20 = sshll.u32 %s95_s19, 4  ;;  %s59_s20 = int_to_ptr.vmem [resolvable:$true] %s58_s20 }
   0x4   :  { %18 = vadd.xlane.f32.xlu0 %v17_v2  ;;  %s72_s1 = scalar_lea.vmem %s59_s20, 256  ;;  %p77_p1 = scmp.lt.s32.totalorder %s59_s20, %s59_s20 }
   0x5   :  { %p73_p0 = scmp.ne.s32.totalorder %s59_s20, %s72_s1  ;;  %p78_p2 = scmp.lt.s32.totalorder %s72_s1, %s72_s1 }
   0x7   :  { %p79_p3 = por %p78_p2, %p77_p1 }
   0x9   :  { %p80_p4 = pnand %p79_p3, %p73_p0 }
  0x8d   :  { %v19_v3 = vpop.xlane.xlu0 %18 }
  0x8e   :  { %v20_v4 = vmul.f32 0.00390625, %v19_v3 }
  0x90   :  { %v21_v5 = vsub.f32 %v15_v0, %v20_v4  ;;  %v22_v6 = vsub.f32 %v16_v1, %v20_v4 }
  0x92   :  { %v23_v7 = vmul.f32 %v21_v5, %v21_v5  ;;  %v24_v8 = vmul.f32 %v22_v6, %v22_v6 }
  0x94   :  { %v25_v9 = vadd.f32 %v24_v8, %v23_v7 }
  0x96   :  { %26 = vadd.xlane.f32.xlu0 %v25_v9 }
 0x11f   :  { %v27_v11 = vpop.xlane.xlu0 %26 }
 0x120   :  { %v28_v12 = vmul.f32 0.00390625, %v27_v11 }
 0x122   :  { %v31_v13 = vadd.f32 1e-05, %v28_v12 }
 0x124   :  { %70 = vrsqrt.f32 %v31_v13 }
 0x131   :  { %v71_v15 = vpop.eup %70 }
 0x132   :  { %v33_v16 = vmul.f32 %v71_v15, %v29_v14 }
 0x134   :  { %38 = vperm.xlu1 %68, %v33_v16   ;;  %v34_v18 = vmul.f32 %v33_v16, %v20_v4 }
 0x136   :  { %v35_v19 = vsub.f32 %v30_v17, %v34_v18 }
 0x138   :  { %45 = vperm.xlu1 %68, %v35_v19  }
 0x1af   :  { %v39_v20 = vpop.permute.xlu1 %38 }
 0x1b0   :  { %v41_v21 = vmul.f32 %v39_v20, %v15_v0  ;;  %v42_v22 = vmul.f32 %v39_v20, %v16_v1 }
 0x1b3   :  { %v46_v23 = vpop.permute.xlu1 %45 }
 0x1b4   :  { %v48_v24 = vadd.f32 %v46_v23, %v41_v21  ;;  %v49_v25 = vadd.f32 %v46_v23, %v42_v22 }
 0x1b6   :  { %50 = vst [vmem:[#allocation2] sm:$0xff] %v48_v24  ;;  %51 = vst [vmem:[#allocation2 + $0x8] sm:$0xff] %v49_v25 }
 0x1b7   :  { %83 = shalt.err (!%p80_p4)
}
 0x1b8   :  { %61 = dma.vmem_to_hbm [thread:$0]  %s59_s20, 256, %s134_s3, [#allocation3]  }
 0x1b9   :  { %92 = dma.done.wait [#allocation3], 256  }
 0x1ba   :  { %93 = vsyncadd [#allocation3], 4294967040 }
 0x1bb   :  { %65 = vsyncpa [#allocation3], 1 }

</bundles_post_ra>
